<compile_context>
chip_gen: v6e
topology: v6e:2x2x1
jax: 0.10.0
libtpu: 0.0.40
codegen_flags: <defaults>
</compile_context>

<pallas_src>
import functools

import jax
import jax.numpy as jnp
from jax.experimental import pallas as pl
from jax.experimental.pallas import tpu as pltpu

_LANE = 128
# sigmoid(-80) ~= 1.8e-35 in f32: at most 127 padded lanes per sample, so the
# contribution to sum(p) is < 3e-33 -- invisible against smooth = 10.  Kept
# finite (not -inf / -1e30) so exp(-x) never overflows f32.
_PAD_SENTINEL = -80.0


def _round_up(x, m):
    return ((x + m - 1) // m) * m


def _tversky_kernel(ignore_index, rows, tile_rows, acc_rows, tiles_per_split,
                    num_row_tiles, need_tail_mask, use_approx,
                    logit_ref, tgt_ref, sums_ref):
    s_idx = pl.program_id(1)
    r = pl.program_id(2)
    # Global row-tile index (int32 is ample: values stay < rows <= D/128).
    tile_idx = s_idx * tiles_per_split + r

    @pl.when(r == 0)
    def _():
        sums_ref[...] = jnp.zeros_like(sums_ref)

    def fold(v):
        # Reduce a (tile_rows, 128) tile down to a single (acc_rows, 128) vreg
        # with leading-axis adds only (no cross-sublane XLU work per step).
        if acc_rows == 8:
            return v.reshape(tile_rows // 8, 8, _LANE).sum(axis=0)
        # Tiny single-tile case (tile_rows == rows < 8 or not 8-aligned):
        # runs once per (batch, split), so the cross-sublane reduce is free.
        return jnp.sum(v, axis=0, keepdims=True)

    def accumulate(mask_tail):
        x = logit_ref[0].astype(jnp.float32)
        t = tgt_ref[0].astype(jnp.float32)
        # sigmoid = 1 / (1 + exp(-x)); exp and the approximate reciprocal both
        # issue on the EUP slot, leaving the VALU free (review item).
        if use_approx:
            p = pl.reciprocal(1.0 + jnp.exp(-x), approx=True)
        else:
            p = 1.0 / (1.0 + jnp.exp(-x))

        valid = None
        if mask_tail:
            # Row-level tail mask (lane tails were handled by sentinel padding
            # in the wrapper).  Only the final row tile pays for this.
            row = jax.lax.broadcasted_iota(jnp.int32, (tile_rows, _LANE), 0)
            valid = (tile_idx * tile_rows + row) < rows
        if ignore_index is not None:
            # Ignored positions contribute 0 to all three sums (matching the
            # PyTorch reference, which zeroes target AND bg_target there).
            ign = t != jnp.float32(ignore_index)
            valid = ign if valid is None else jnp.logical_and(valid, ign)
        if valid is not None:
            p = jnp.where(valid, p, 0.0)
            t = jnp.where(valid, t, 0.0)

        # Accumulate directly into the resident output block (P3 pattern).
        sums_ref[0, 0] += fold(p * t)   # -> P_G
        sums_ref[0, 1] += fold(p)       # -> sum(sigmoid)  (P_NG = sum - P_G)
        sums_ref[0, 2] += fold(t)       # -> sum(target)   (NP_G = sum - P_G)

    if need_tail_mask:
        last = num_row_tiles - 1

        @pl.when(tile_idx < last)
        def _():
            accumulate(False)

        @pl.when(tile_idx == last)
        def _():
            accumulate(True)
    else:
        accumulate(False)


def binary_tversky_loss_v2(output, target, *, alpha=0.3, beta=0.7,
                           ignore_index=None, reduction="mean",
                           tile_rows=None,
                           target_block_bytes=4 * 1024 * 1024,
                           core_split=None, approx_sigmoid=True):
    """Pallas implementation of BinaryTverskyLossV2.forward.

    output, target: (N, 1, H, W) (or any (N, ...)) arrays; output are logits.
    target_block_bytes: per-input DMA block size (bump to 6-8 MiB on v7x hot
    paths); core_split: None = auto (2-way reduction split when N == 1).
    """
    # Normalize alpha/beta like the PyTorch __init__ does.
    s = alpha + beta
    if s != 1:
        alpha = alpha / s
        beta = beta / s
    smooth = 10.0

    n = output.shape[0]
    d = 1
    for dim in output.shape[1:]:
        d *= int(dim)

    out2 = output.reshape(n, d)
    tgt2 = target.reshape(n, d)

    # Lane alignment.  Padded logits use a finite negative sentinel so
    # sigmoid(pad) == 0 and padded targets are 0 => padded lanes contribute
    # nothing, so no per-tile lane mask is ever needed.  This single pad pass
    # is only paid when D % 128 != 0.
    # TODO(synk): for ragged-D hot paths, fuse this pad upstream of the call.
    d_lane = _round_up(d, _LANE)
    if d_lane != d:
        pad = d_lane - d
        out2 = jnp.pad(out2, ((0, 0), (0, pad)), constant_values=_PAD_SENTINEL)
        tgt2 = jnp.pad(tgt2, ((0, 0), (0, pad)), constant_values=0)
    rows = d_lane // _LANE

    # Free contiguous reshape: pack D into (rows, 128) so sublanes are full
    # even when N < 8.
    out3 = out2.reshape(n, rows, _LANE)
    tgt3 = tgt2.reshape(n, rows, _LANE)

    # ---- tiling ----
    if tile_rows is None:
        itemsize = max(jnp.dtype(output.dtype).itemsize,
                       jnp.dtype(target.dtype).itemsize, 1)
        tile_rows = max(8, (target_block_bytes // (_LANE * itemsize)) // 8 * 8)

    # Optional 2-way split of the reduction axis across TensorCores (v7x
    # megacore) when the batch axis alone cannot feed both cores.  Harmless on
    # single-core generations (same total tiles, one extra tiny output block).
    n_split = core_split if core_split is not None else (2 if n == 1 else 1)
    if n_split > 1:
        cap = max(8, _round_up(pl.cdiv(rows, n_split), 8))
        tile_rows = min(tile_rows, cap)

    tile_rows = int(min(tile_rows, rows))
    if tile_rows < rows:
        tile_rows = max(8, (tile_rows // 8) * 8)

    num_row_tiles = pl.cdiv(rows, tile_rows)
    # Keep every grid step on a real block (no phantom tiles / clamped maps):
    # only split when the tile count divides evenly (always true for the auto
    # cap above, which yields exactly n_split tiles).
    if n_split > 1 and num_row_tiles % n_split != 0:
        n_split = 1
    tiles_per_split = num_row_tiles // n_split

    need_tail_mask = (rows % tile_rows) != 0
    acc_rows = 8 if tile_rows % 8 == 0 else 1

    kernel = functools.partial(_tversky_kernel, ignore_index, rows, tile_rows,
                               acc_rows, tiles_per_split, num_row_tiles,
                               need_tail_mask, approx_sigmoid)

    in_map = lambda b, s, r: (b, s * tiles_per_split + r, 0)
    out_map = lambda b, s, r: (b * n_split + s, 0, 0, 0)

    in_bytes = n * d * (jnp.dtype(output.dtype).itemsize
                        + jnp.dtype(target.dtype).itemsize)
    cost = pl.CostEstimate(flops=8 * n * d,
                           transcendentals=n * d,
                           bytes_accessed=in_bytes)

    sums = pl.pallas_call(
        kernel,
        out_shape=jax.ShapeDtypeStruct((n * n_split, 3, acc_rows, _LANE),
                                       jnp.float32),
        grid_spec=pltpu.PrefetchScalarGridSpec(
            num_scalar_prefetch=0,
            grid=(n, n_split, tiles_per_split),
            in_specs=[
                pl.BlockSpec((1, tile_rows, _LANE), in_map),
                pl.BlockSpec((1, tile_rows, _LANE), in_map),
            ],
            out_specs=pl.BlockSpec((1, 3, acc_rows, _LANE), out_map),
        ),
        compiler_params=pltpu.CompilerParams(
            dimension_semantics=("parallel", "parallel", "arbitrary"),
            vmem_limit_bytes=48 * 1024 * 1024,
        ),
        cost_estimate=cost,
    )(out3, tgt3)

    # Tiny finalization in plain XLA: combine splits / sublanes / lanes and
    # evaluate the Tversky formula (exact function of the three sums).
    totals = sums.reshape(n, n_split, 3, -1).sum(axis=(1, 3))   # (N, 3) f32
    pg, sp, st = totals[:, 0], totals[:, 1], totals[:, 2]
    png = sp - pg          # sum(p * (1 - t)) over valid positions
    npg = st - pg          # sum((1 - p) * t) over valid positions
    loss = 1.0 - pg / (pg + alpha * png + beta * npg + smooth)

    if reduction == "none":
        return loss
    elif reduction == "sum":
        return jnp.sum(loss)
    else:  # 'mean'
        return jnp.mean(loss)


def _reference(output, target, alpha=0.3, beta=0.7, ignore_index=None,
               reduction="mean"):
    """Pure-JAX port of the PyTorch module (including ignore_index semantics)."""
    s = alpha + beta
    if s != 1:
        alpha, beta = alpha / s, beta / s
    smooth = 10.0
    n = output.shape[0]
    out = output.astype(jnp.float32)
    tgt = target.astype(jnp.float32)
    bg = 1.0 - tgt
    if ignore_index is not None:
        valid = (tgt != ignore_index).astype(jnp.float32)
        out = out * valid
        tgt = tgt * valid
        bg = bg * valid
    p = jax.nn.sigmoid(out).reshape(n, -1)
    tgt = tgt.reshape(n, -1)
    bg = bg.reshape(n, -1)
    pg = jnp.sum(p * tgt, axis=1)
    png = jnp.sum(p * bg, axis=1)
    npg = jnp.sum((1.0 - p) * tgt, axis=1)
    ti = pg / (pg + alpha * png + beta * npg + smooth)
    loss = 1.0 - ti
    if reduction == "none":
        return loss
    if reduction == "sum":
        return jnp.sum(loss)
    return jnp.mean(loss)


if __name__ == "__main__":
    key = jax.random.PRNGKey(0)
    k1, k2, k3, k4, k5, k6, k7, k8 = jax.random.split(key, 8)

    # Approx-reciprocal sigmoid (~2^-12 rel error on p) perturbs the loss by
    # ~1e-4; 5e-3 absolute tolerance leaves a wide safety margin.
    APPROX_TOL = 5e-3

    # Case 1: [N, 1, H, W] logits, lane-aligned D, mean reduction.
    N, C, H, W = 2, 1, 16, 16
    logits = jax.random.normal(k1, (N, C, H, W), dtype=jnp.float32)
    target = (jax.random.uniform(k2, (N, C, H, W)) > 0.5).astype(jnp.float32)
    loss = jax.block_until_ready(
        binary_tversky_loss_v2(logits, target, alpha=0.3, beta=0.7))
    ref = jax.block_until_ready(_reference(logits, target, alpha=0.3, beta=0.7))
    assert jnp.allclose(loss, ref, rtol=1e-5, atol=APPROX_TOL), (loss, ref)

    # Case 2: ragged D (sentinel lane pad), ignore_index, per-sample losses,
    # exact-divide sigmoid path -> tight tolerance parity with the reference.
    H2, W2 = 17, 19
    logits2 = jax.random.normal(k3, (N, C, H2, W2), dtype=jnp.float32)
    t2 = (jax.random.uniform(k4, (N, C, H2, W2)) > 0.5).astype(jnp.float32)
    t2 = t2.at[:, :, :2, :].set(255.0)  # ignored region
    loss2 = jax.block_until_ready(binary_tversky_loss_v2(
        logits2, t2, alpha=0.4, beta=0.8, ignore_index=255, reduction="none",
        approx_sigmoid=False))
    ref2 = jax.block_until_ready(_reference(
        logits2, t2, alpha=0.4, beta=0.8, ignore_index=255, reduction="none"))
    assert jnp.allclose(loss2, ref2, rtol=1e-5, atol=1e-5), (loss2, ref2)

    # Case 3: N == 1 -> automatic 2-way core split of the reduction axis
    # (v7x megacore), folded (8,128) accumulators.
    logits3 = jax.random.normal(k5, (1, 1, 64, 64), dtype=jnp.float32)
    t3 = (jax.random.uniform(k6, (1, 1, 64, 64)) > 0.5).astype(jnp.float32)
    loss3 = jax.block_until_ready(binary_tversky_loss_v2(logits3, t3))
    ref3 = jax.block_until_ready(_reference(logits3, t3))
    assert jnp.allclose(loss3, ref3, rtol=1e-5, atol=APPROX_TOL), (loss3, ref3)

    # Case 4: N == 1 with ragged D AND a partial last row tile: sentinel lane
    # pad + tail mask gated onto the final tile + core split, all together.
    logits4 = jax.random.normal(k7, (1, 1, 63, 80), dtype=jnp.float32)
    t4 = (jax.random.uniform(k8, (1, 1, 63, 80)) > 0.5).astype(jnp.float32)
    loss4 = jax.block_until_ready(
        binary_tversky_loss_v2(logits4, t4, reduction="sum"))
    ref4 = jax.block_until_ready(_reference(logits4, t4, reduction="sum"))
    assert jnp.allclose(loss4, ref4, rtol=1e-5, atol=APPROX_TOL), (loss4, ref4)

    print("KERNEL_OK")
</pallas_src>

<mosaic_0001>
module attributes {stable_mosaic.version = 11 : i64} {
  func.func @_tversky_kernel(%arg0: i32, %arg1: i32, %arg2: i32, %arg3: memref<1x2x128xf32, #tpu.memory_space<vmem>>, %arg4: memref<1x2x128xf32, #tpu.memory_space<vmem>>, %arg5: memref<1x3x1x128xf32, #tpu.memory_space<vmem>>) attributes {dimension_semantics = [#tpu.dimension_semantics<parallel>, #tpu.dimension_semantics<parallel>, #tpu.dimension_semantics<arbitrary>], iteration_bounds = array<i64: 2, 1, 1>, scalar_prefetch = 0 : i64, scratch_operands = 0 : i64, tpu.core_type = #tpu.core_type<tc>, window_params = [{transform_indices = @transform_0, window_bounds = array<i64: 1, 2, 128>}, {transform_indices = @transform_1, window_bounds = array<i64: 1, 2, 128>}, {transform_indices = @transform_2, window_bounds = array<i64: 1, 3, 1, 128>}]} {
    %c0_i32 = arith.constant 0 : i32
    %0 = arith.cmpi eq, %arg2, %c0_i32 : i32
    %1 = arith.extui %0 : i1 to i32
    %c0_i32_0 = arith.constant 0 : i32
    %2 = arith.cmpi ne, %1, %c0_i32_0 : i32
    scf.if %2 {
      %cst_32 = arith.constant 0.000000e+00 : f32
      %38 = vector.broadcast %cst_32 : f32 to vector<1x3x1x128xf32>
      %c0_33 = arith.constant 0 : index
      %c0_34 = arith.constant 0 : index
      %c0_35 = arith.constant 0 : index
      %c0_36 = arith.constant 0 : index
      %39 = vector.load %arg5[%c0_33, %c0_34, %c0_35, %c0_36] : memref<1x3x1x128xf32, #tpu.memory_space<vmem>>, vector<1x3x1x128xf32>
      tpu.vector_store %arg5[%c0_33, %c0_34, %c0_35, %c0_36], %38 {strides = array<i32>} : memref<1x3x1x128xf32, #tpu.memory_space<vmem>>, vector<1x3x1x128xf32>,
    } else {
    }
    %c0 = arith.constant 0 : index
    %c0_1 = arith.constant 0 : index
    %c0_2 = arith.constant 0 : index
    %3 = vector.load %arg3[%c0, %c0_1, %c0_2] : memref<1x2x128xf32, #tpu.memory_space<vmem>>, vector<1x2x128xf32>
    %4 = vector.shape_cast %3 : vector<1x2x128xf32> to vector<2x128xf32>
    %c0_3 = arith.constant 0 : index
    %c0_4 = arith.constant 0 : index
    %c0_5 = arith.constant 0 : index
    %5 = vector.load %arg4[%c0_3, %c0_4, %c0_5] : memref<1x2x128xf32, #tpu.memory_space<vmem>>, vector<1x2x128xf32>
    %6 = vector.shape_cast %5 : vector<1x2x128xf32> to vector<2x128xf32>
    %cst = arith.constant 0.000000e+00 : f32
    %7 = vector.broadcast %cst : f32 to vector<2x128xf32>
    %8 = arith.subf %7, %4 : vector<2x128xf32>
    %9 = math.exp %8 : vector<2x128xf32>
    %cst_6 = arith.constant 1.000000e+00 : f32
    %10 = vector.broadcast %cst_6 : f32 to vector<2x128xf32>
    %11 = arith.addf %10, %9 : vector<2x128xf32>
    %12 = tpu.reciprocal %11 {approx = true} : vector<2x128xf32> -> vector<2x128xf32>
    %c0_7 = arith.constant 0 : index
    %c0_8 = arith.constant 0 : index
    %c0_9 = arith.constant 0 : index
    %c0_10 = arith.constant 0 : index
    %13 = vector.load %arg5[%c0_7, %c0_8, %c0_9, %c0_10] : memref<1x3x1x128xf32, #tpu.memory_space<vmem>>, vector<1x1x1x128xf32>
    %14 = vector.shape_cast %13 : vector<1x1x1x128xf32> to vector<1x128xf32>
    %15 = arith.mulf %12, %6 : vector<2x128xf32>
    %cst_11 = arith.constant dense<0.000000e+00> : vector<128xf32>
    %16 = vector.multi_reduction <add>, %15, %cst_11 [0] : vector<2x128xf32> to vector<128xf32>
    %17 = vector.shape_cast %16 : vector<128xf32> to vector<1x128xf32>
    %18 = arith.addf %14, %17 : vector<1x128xf32>
    %c0_12 = arith.constant 0 : index
    %c0_13 = arith.constant 0 : index
    %c0_14 = arith.constant 0 : index
    %c0_15 = arith.constant 0 : index
    %19 = vector.load %arg5[%c0_12, %c0_13, %c0_14, %c0_15] : memref<1x3x1x128xf32, #tpu.memory_space<vmem>>, vector<1x1x1x128xf32>
    %20 = vector.shape_cast %19 : vector<1x1x1x128xf32> to vector<1x128xf32>
    %21 = vector.shape_cast %18 : vector<1x128xf32> to vector<1x1x1x128xf32>
    tpu.vector_store %arg5[%c0_12, %c0_13, %c0_14, %c0_15], %21 {strides = array<i32>} : memref<1x3x1x128xf32, #tpu.memory_space<vmem>>, vector<1x1x1x128xf32>,
    %c0_16 = arith.constant 0 : index
    %c1 = arith.constant 1 : index
    %c0_17 = arith.constant 0 : index
    %c0_18 = arith.constant 0 : index
    %22 = vector.load %arg5[%c0_16, %c1, %c0_17, %c0_18] : memref<1x3x1x128xf32, #tpu.memory_space<vmem>>, vector<1x1x1x128xf32>
    %23 = vector.shape_cast %22 : vector<1x1x1x128xf32> to vector<1x128xf32>
    %cst_19 = arith.constant dense<0.000000e+00> : vector<128xf32>
    %24 = vector.multi_reduction <add>, %12, %cst_19 [0] : vector<2x128xf32> to vector<128xf32>
    %25 = vector.shape_cast %24 : vector<128xf32> to vector<1x128xf32>
    %26 = arith.addf %23, %25 : vector<1x128xf32>
    %c0_20 = arith.constant 0 : index
    %c1_21 = arith.constant 1 : index
    %c0_22 = arith.constant 0 : index
    %c0_23 = arith.constant 0 : index
    %27 = vector.load %arg5[%c0_20, %c1_21, %c0_22, %c0_23] : memref<1x3x1x128xf32, #tpu.memory_space<vmem>>, vector<1x1x1x128xf32>
    %28 = vector.shape_cast %27 : vector<1x1x1x128xf32> to vector<1x128xf32>
    %29 = vector.shape_cast %26 : vector<1x128xf32> to vector<1x1x1x128xf32>
    tpu.vector_store %arg5[%c0_20, %c1_21, %c0_22, %c0_23], %29 {strides = array<i32>} : memref<1x3x1x128xf32, #tpu.memory_space<vmem>>, vector<1x1x1x128xf32>,
    %c0_24 = arith.constant 0 : index
    %c2 = arith.constant 2 : index
    %c0_25 = arith.constant 0 : index
    %c0_26 = arith.constant 0 : index
    %30 = vector.load %arg5[%c0_24, %c2, %c0_25, %c0_26] : memref<1x3x1x128xf32, #tpu.memory_space<vmem>>, vector<1x1x1x128xf32>
    %31 = vector.shape_cast %30 : vector<1x1x1x128xf32> to vector<1x128xf32>
    %cst_27 = arith.constant dense<0.000000e+00> : vector<128xf32>
    %32 = vector.multi_reduction <add>, %6, %cst_27 [0] : vector<2x128xf32> to vector<128xf32>
    %33 = vector.shape_cast %32 : vector<128xf32> to vector<1x128xf32>
    %34 = arith.addf %31, %33 : vector<1x128xf32>
    %c0_28 = arith.constant 0 : index
    %c2_29 = arith.constant 2 : index
    %c0_30 = arith.constant 0 : index
    %c0_31 = arith.constant 0 : index
    %35 = vector.load %arg5[%c0_28, %c2_29, %c0_30, %c0_31] : memref<1x3x1x128xf32, #tpu.memory_space<vmem>>, vector<1x1x1x128xf32>
    %36 = vector.shape_cast %35 : vector<1x1x1x128xf32> to vector<1x128xf32>
    %37 = vector.shape_cast %34 : vector<1x128xf32> to vector<1x1x1x128xf32>
    tpu.vector_store %arg5[%c0_28, %c2_29, %c0_30, %c0_31], %37 {strides = array<i32>} : memref<1x3x1x128xf32, #tpu.memory_space<vmem>>, vector<1x1x1x128xf32>,
    return
  }
  func.func @transform_0(%arg0: i32, %arg1: i32, %arg2: i32) -> (i32, i32, i32) {
    %c1_i32 = arith.constant 1 : i32
    %0 = arith.muli %arg1, %c1_i32 : i32
    %1 = arith.addi %0, %arg2 : i32
    %c0_i32 = arith.constant 0 : i32
    %c0_i32_0 = arith.constant 0 : i32
    return %arg0, %1, %c0_i32 : i32, i32, i32
  }
  func.func @transform_1(%arg0: i32, %arg1: i32, %arg2: i32) -> (i32, i32, i32) {
    %c1_i32 = arith.constant 1 : i32
    %0 = arith.muli %arg1, %c1_i32 : i32
    %1 = arith.addi %0, %arg2 : i32
    %c0_i32 = arith.constant 0 : i32
    %c0_i32_0 = arith.constant 0 : i32
    return %arg0, %1, %c0_i32 : i32, i32, i32
  }
  func.func @transform_2(%arg0: i32, %arg1: i32, %arg2: i32) -> (i32, i32, i32, i32) {
    %c1_i32 = arith.constant 1 : i32
    %0 = arith.muli %arg0, %c1_i32 : i32
    %1 = arith.addi %0, %arg1 : i32
    %c0_i32 = arith.constant 0 : i32
    %c0_i32_0 = arith.constant 0 : i32
    %c0_i32_1 = arith.constant 0 : i32
    %c0_i32_2 = arith.constant 0 : i32
    return %1, %c0_i32, %c0_i32_0, %c0_i32_1 : i32, i32, i32, i32
  }
}

</mosaic_0001>

<bundles_post_ra>
// kernel: tpu_custom_call.1
= control target key start
LH: loop header
LB: loop body
LE: loop exit
PB: predicated region body
PF: predicated region fallthrough
CT: control target
= control target key end

     0   :  { %7 = vsyncpa [#allocation3], 0  ;;  %s855_s0 = inlined_call_operand.hbm [shape: f32[2,2,128], index: 0, kind: input, shape index: {}]   ;;  %s856_s1 = inlined_call_operand.hbm [shape: f32[2,2,128], index: 1, kind: input, shape index: {}]   ;;  %s857_s2 = inlined_call_operand.hbm [shape: f32[2,3,1,128], index: 2, kind: output, shape index: {}]  }
   0x1   :  { %9 = vsyncpa [#allocation3 + $0x1], 0 }
   0x2   :  { %10 = vsyncpa [#allocation6], 0 }
   0x3   :  { %12 = vsyncpa [#allocation6 + $0x1], 0 }
   0x4   :  { %13 = vsyncpa [#allocation4], 0 }
   0x5   :  { %15 = vsyncpa [#allocation4 + $0x1], 0  ;;  %s664_s9 = smov 0   ;;  %s666_s10 = smov 0  }
   0x6   :  { %s668_s11 = smov 0   ;;  %s670_s12 = smov 0  }
   0x7   :  { %s672_s13 = smov 0   ;;  %s674_s14 = smov 0  }
   0x8 LB: > { %s407_s15 = sadd.s32 4294967295, %s641_s14   ;;  %s408_s16 = sadd.s32 4294967294, %s641_s14   ;;  %s641_s14 = sphi %s674_s14, %s21_s14   ;;  %s637_s13 = sphi %s672_s13, %s869_s13   ;;  %s633_s12 = sphi %s670_s12, %s868_s12   ;;  %s629_s11 = sphi %s668_s11, %s867_s11   ;;  %s625_s10 = sphi %s666_s10, %s866_s10   ;;  %s621_s9 = sphi %s664_s9, %s865_s9  }
   0x9   : > { %s40_s17 = sadd.s32 1, %s637_s13  ;;  %s51_s18 = sadd.s32 1, %s629_s11 }
   0xa   : > { %p42_p0 = scmp.ge.s32.totalorder %s40_s17, 2  ;;  %p58_p1 = scmp.ne.s32.totalorder %s629_s11, %s625_s10 }
   0xb   : > { %p59_p2 = scmp.eq.s32.totalorder %s641_s14, 0  ;;  %p64_p3 = scmp.ne.s32.totalorder %s625_s10, %s621_s9 }
   0xc   : > { %s871_s17 = smov (%p42_p0, %s40_s17), 0  ;;  %p65_p5 = scmp.eq.s32.totalorder %s407_s15, 0 }
   0xd   : > { %p705_p4 = por %p59_p2, %p58_p1  ;;  %s46_s20 = ssub.s32 %s637_s13, %s871_s17 }
   0xe   : > { %p120_p6 = scmp.eq.s32.totalorder %s407_s15, 1  ;;  %p49_p7 = scmp.eq.s32.totalorder %s46_s20, 0 }
   0xf   : > { %p711_p8 = por %p65_p5, %p64_p3  ;;  %p126_p10 = scmp.eq.s32.totalorder %s408_s16, 1 }
  0x10   : > { %p715_p9 = por %p120_p6, %p58_p1  ;;  %p444_p13 = scmp.lt.s32.totalorder %s641_s14, 2 }
  0x11   : > { %s720_s23 = scalar_select %p49_p7, %s629_s11, %s51_s18  }
  0x12   : > { %p722_p11 = por %p126_p10, %p64_p3  ;;  %s729_s25 = sand.u32 1, %s629_s11  }
  0x13   : > { %s411_s26 = sshll.u32 %s729_s25, 1  ;;  %s412_s27 = sshll.u32 %s637_s13, 5 }
  0x14   : > { %s157_s30 = scalar_lea.hbm %s855_s0, %s412_s27  ;;  %s150_s3 = scalar_lea.vmem [#allocation2], %s411_s26 }
  0x15   : > { %s159_s4 = sshll.u32 %s150_s3, 4  ;;  %p738_p0 = pnand %p444_p13, %p705_p4  ;;  %s160_s4 = int_to_ptr.vmem [resolvable:$true] %s159_s4 }
  0x16   : > { %p415_p1 = scmp.ge.s32.totalorder %s641_s14, 1  ;;  %p184_p2 = scmp.lt.s32.totalorder %s641_s14, 3 }
  0x17   : > { %s147_s6 = scalar_lea.sflag [#allocation3], %s729_s25  ;;  %p503_p3 = pneg %p738_p0 }
  0x18   : > { %s514_s7 = scalar_lea.vmem %s160_s4, 32  ;;  %s643_s8 = smov [#allocation2]  }
  0x19   : > { %p515_p5 = scmp.ne.s32.totalorder %s160_s4, %s514_s7  ;;  %s519_s15 = sshll.u32 %s643_s8, 4  ;;  %s520_s15 = int_to_ptr.vmem [resolvable:$false] %s519_s15 }
  0x1a   : > { %s521_s16 = scalar_lea.vmem %s520_s15, 64  ;;  %p522_p4 = scmp.lt.s32.totalorder %s160_s4, %s520_s15 }
  0x1b   : > { %p517_p6 = pnand %p515_p5, %p503_p3  ;;  %p523_p10 = scmp.lt.s32.totalorder %s521_s16, %s514_s7 }
  0x1d   : > { %p518_p7 = pneg %p517_p6  ;;  %p524_p13 = por %p523_p10, %p522_p4 }
  0x1f   : > { %p525_p12 = pnand %p524_p13, %p518_p7 }
  0x21   : > { %528 = shalt.err (!%p525_p12)
}
  0x22   : > { %436 = dma.hbm_to_vmem [thread:$0]  (!%p738_p0), %s157_s30, 32, %s160_s4, %s147_s6  }
  0x23   : > { %p756_p5 = pnand %p415_p1, %p184_p2  ;;  %s177_s28 = scalar_lea.hbm %s856_s1, %s412_s27 }
  0x24   : > { %s170_s29 = scalar_lea.vmem [#allocation5], %s411_s26  ;;  %s167_s7 = scalar_lea.sflag [#allocation6], %s729_s25 }
  0x25   : > { %s179_s3 = sshll.u32 %s170_s29, 4  ;;  %s644_s30 = smov [#allocation5]   ;;  %s180_s3 = int_to_ptr.vmem [resolvable:$true] %s179_s3 }
  0x26   : > { %s542_s8 = scalar_lea.vmem %s180_s3, 32  ;;  %s547_s4 = sshll.u32 %s644_s30, 4  ;;  %s548_s4 = int_to_ptr.vmem [resolvable:$false] %s547_s4 }
  0x27   : > { %p543_p12 = scmp.ne.s32.totalorder %s180_s3, %s542_s8  ;;  %s549_s6 = scalar_lea.vmem %s548_s4, 64 }
  0x28   : > { %p550_p1 = scmp.lt.s32.totalorder %s180_s3, %s548_s4  ;;  %p551_p2 = scmp.lt.s32.totalorder %s549_s6, %s542_s8 }
  0x29   : > { %p545_p6 = pnand %p543_p12, %p503_p3 }
  0x2a   : > { %p552_p4 = por %p551_p2, %p550_p1 }
  0x2b   : > { %p546_p7 = pneg %p545_p6 }
  0x2d   : > { %p553_p10 = pnand %p552_p4, %p546_p7 }
  0x2f   : > { %556 = shalt.err (!%p553_p10)
}
  0x30   : > { %439 = dma.hbm_to_vmem [thread:$0]  (!%p738_p0), %s177_s28, 32, %s180_s3, %s167_s7  }
  0x31   : > { %188 = sbr.rel (%p756_p5) target bundleno = 123 (0x7b), region = 28  ;;  %s772_s25 = sand.u32 (!%p756_p5), 1, %s625_s10  }
  0x32   : > { %s416_s26 = sshll.u32 (!%p756_p5), %s772_s25, 1  ;;  %s191_s27 = scalar_lea.sflag (!%p756_p5), [#allocation3], %s772_s25 }
  0x33   : > { %s194_s15 = scalar_lea.vmem (!%p756_p5), [#allocation2], %s416_s26 }
  0x36   : > { %608 = dma.done.wait (%p711_p8), %s191_s27, 32  }
  0x37   : > { %610 = vsyncadd (%p711_p8), %s191_s27, 4294967264  ;;  %s200_s5 = scalar_lea.sflag [#allocation6], %s772_s25  ;;  %s203_s16 = scalar_lea.vmem [#allocation5], %s416_s26 }
  0x38   : > { %612 = dma.done.wait (%p711_p8), %s200_s5, 32  }
  0x39   : > { %614 = vsyncadd (%p711_p8), %s200_s5, 4294967264  ;;  %s425_s18 = smul.u32 3, %s772_s25  ;;  %v645_v0 = vmov 0.0   ;;  %vm248_vm0 = vcmask 1041408   ;;  %v239_v1 = vld [vmem:[%s194_s15] sm:$0x3] }
  0x3a   : > { %v240_v2 = vld [vmem:[%s203_s16] sm:$0x3]  ;;  %v241_v3 = vsub.f32 0.0, %v239_v1  ;;  %s426_s21 = smul.u32 48, %s633_s12  ;;  %s281_s7 = scalar_lea.sflag [#allocation4], %s772_s25 }
  0x3b   : > { %s786_s19 = scalar_lea.vmem [#allocation7], %s425_s18  ;;  %v271_v4 = vsel %vm248_vm0, %v240_v2, 0.0  ;;  %s646_s12 = smov [#allocation7]  }
  0x3c   : > { %236 = vst [vmem:[%s786_s19] sm:$0x1] %v645_v0  ;;  %237 = vst [vmem:[%s786_s19 + $0x1] sm:$0x1] %v645_v0  ;;  %v272_v5 = vrot.slane %v271_v4, 4  ;;  %v242_v6 = vmul.f32 1.442695, %v241_v3  ;;  %s804_s3 = scalar_lea.hbm %s857_s2, %s426_s21 }
  0x3d   : > { %238 = vst [vmem:[%s786_s19 + $0x2] sm:$0x1] %v645_v0  ;;  %s295_s20 = sshll.u32 %s786_s19, 4  ;;  %s561_s30 = sshll.u32 %s646_s12, 4  ;;  %s806_s20 = int_to_ptr.vmem [resolvable:$true] %s295_s20  ;;  %s562_s30 = int_to_ptr.vmem [resolvable:$false] %s561_s30 }
  0x3e   : > { %v273_v7 = vadd.f32 %v272_v5, %v271_v4  ;;  %497 = vpow2.f32 %v242_v6  ;;  %s557_s8 = scalar_lea.vmem %s806_s20, 48  ;;  %s563_s4 = scalar_lea.vmem %s562_s30, 96 }
  0x3f   : > { %p558_p8 = scmp.ne.s32.totalorder %s806_s20, %s557_s8  ;;  %p564_p13 = scmp.lt.s32.totalorder %s806_s20, %s562_s30 }
  0x40   : > { %v274_v8 = vrot.slane %v273_v7, 2  ;;  %p565_p5 = scmp.lt.s32.totalorder %s563_s4, %s557_s8 }
  0x41   : > { %p559_p0 = pnand %p558_p8, %p715_p9 }
  0x42   : > { %v275_v9 = vadd.f32 %v274_v8, %v273_v7  ;;  %p566_p12 = por %p565_p5, %p564_p13 }
  0x43   : > { %v418_v29 = vld [vmem:[%s786_s19 + $0x1] sm:$0x1]  ;;  %v246_v32 = vld [vmem:[%s786_s19] sm:$0x1]  ;;  %p560_p3 = pneg %p559_p0 }
  0x44   : > { %v276_v10 = vrot.slane %v275_v9, 1  ;;  %v420_v11 = vld [vmem:[%s786_s19 + $0x2] sm:$0x1] }
  0x45   : > { %p567_p6 = pnand %p566_p12, %p560_p3 }
  0x46   : > { %v277_v12 = vadd.f32 %v276_v10, %v275_v9 }
  0x48   : > { %v278_v13 = vadd.f32 %v420_v11, %v277_v12 }
  0x4a   : > { %421 = vst [vmem:[%s786_s19 + $0x2] sm:$0x1] %v278_v13 }
  0x4b   : > { %v498_v14 = vpop.eup %497 }
  0x4c   : > { %v244_v15 = vadd.f32 1.0, %v498_v14 }
  0x4e   : > { %499 = vrcp.f32 %v244_v15 }
  0x5b   : > { %v500_v16 = vpop.eup %499 }
  0x5c   : > { %v247_v17 = vmul.f32 %v500_v16, %v240_v2  ;;  %v260_v18 = vsel %vm248_vm0, %v500_v16, 0.0 }
  0x5d   : > { %v261_v19 = vrot.slane %v260_v18, 4 }
  0x5e   : > { %v249_v20 = vsel %vm248_vm0, %v247_v17, 0.0 }
  0x5f   : > { %v250_v21 = vrot.slane %v249_v20, 4  ;;  %v262_v22 = vadd.f32 %v261_v19, %v260_v18 }
  0x61   : > { %v251_v23 = vadd.f32 %v250_v21, %v249_v20  ;;  %v263_v24 = vrot.slane %v262_v22, 2 }
  0x63   : > { %v252_v25 = vrot.slane %v251_v23, 2  ;;  %v264_v26 = vadd.f32 %v263_v24, %v262_v22 }
  0x65   : > { %v253_v27 = vadd.f32 %v252_v25, %v251_v23  ;;  %v265_v28 = vrot.slane %v264_v26, 1 }
  0x67   : > { %v254_v30 = vrot.slane %v253_v27, 1  ;;  %v266_v31 = vadd.f32 %v265_v28, %v264_v26 }
  0x69   : > { %v255_v33 = vadd.f32 %v254_v30, %v253_v27  ;;  %v267_v34 = vadd.f32 %v418_v29, %v266_v31 }
  0x6b   : > { %v256_v35 = vadd.f32 %v255_v33, %v246_v32  ;;  %419 = vst [vmem:[%s786_s19 + $0x1] sm:$0x1] %v267_v34 }
  0x6d   : > { %257 = vst [vmem:[%s786_s19] sm:$0x1] %v256_v35 }
  0x6e   : > { %570 = shalt.err (!%p567_p6)
}
  0x6f   : > { %s571_s6 = scalar_lea.hbm %s804_s3, 48  ;;  %s575_s15 = scalar_lea.hbm %s857_s2, 96 }
  0x70   : > { %p572_p7 = scmp.ne.s32.totalorder %s804_s3, %s571_s6  ;;  %p576_p4 = scmp.lt.s32.totalorder %s804_s3, %s857_s2 }
  0x71   : > { %p577_p10 = scmp.lt.s32.totalorder %s575_s15, %s571_s6 }
  0x72   : > { %p573_p1 = pnand %p572_p7, %p715_p9 }
  0x73   : > { %p578_p8 = por %p577_p10, %p576_p4 }
  0x74   : > { %p574_p2 = pneg %p573_p1 }
  0x76   : > { %p579_p0 = pnand %p578_p8, %p574_p2 }
  0x78   : > { %582 = shalt.err (!%p579_p0)
}
  0x79   : > { %s647_s18 = smov 16   ;;  %s648_s19 = smov 1  }
  0x7a   : > { %431 = dma.vmem_to_hbm [thread:$0]  (%p715_p9), %s806_s20, 48, %s804_s3, %s281_s7, %s647_s18, %s647_s18, %s648_s19  }
  0x7b PF: > { %s310_s21 = sand.u32 1, %s621_s9   ;;  %p864_p3 = scmp.ge.s32.totalorder %s641_s14, 2 }
  0x7c   : > { %s311_s28 = scalar_lea.sflag [#allocation4], %s310_s21 }
  0x7d   : > { %p441_p13 = pnand %p864_p3, %p722_p11 }
  0x7f   : > { %p442_p5 = pneg %p441_p13 }
  0x81   : > { %616 = dma.done.wait (%p442_p5), %s311_s28, 48  }
  0x82   : > { %618 = vsyncadd (%p442_p5), %s311_s28, 4294967248  ;;  %s21_s14 = sadd.s32 1, %s641_s14   ;;  %s865_s9 = smov %s625_s10 }
  0x83   : > { %p18_p12 = scmp.ge.s32.totalorder %s21_s14, 4   ;;  %s866_s10 = smov %s629_s11 }
  0x84   : > { %s867_s11 = smov %s720_s23  ;;  %s868_s12 = smov %s637_s13 }
  0x85   : > { %s869_s13 = smov %s871_s17  ;;  %20 = sbr.rel (!%p18_p12) target bundleno = 8 (0x8), region = 92 }
  0x8a   :  { %316 = vsyncpa [#allocation3], 1 }
  0x8b   :  { %318 = vsyncpa [#allocation3 + $0x1], 1 }
  0x8c   :  { %319 = vsyncpa [#allocation6], 1 }
  0x8d   :  { %321 = vsyncpa [#allocation6 + $0x1], 1 }
  0x8e   :  { %322 = vsyncpa [#allocation4], 1 }
  0x8f   :  { %324 = vsyncpa [#allocation4 + $0x1], 1 }

</bundles_post_ra>
